<compile_context>
chip_gen: v5e
topology: v5e:2x2
jax: 0.10.0
libtpu: 0.0.40
codegen_flags: <defaults>
</compile_context>

<pallas_src>
import functools

import jax
import jax.numpy as jnp
from jax.experimental import pallas as pl
from jax.experimental.pallas import tpu as pltpu  # noqa: F401  (TPU backend import)


# ----------------------------- fused LSTM + MLP-head kernel -----------------------------
def fused_lstm_head_kernel(x_ref, w_ref, b_ref, out_ref, *, batch):
    TB, D = x_ref.shape
    B = batch
    T = TB // B
    G = w_ref.shape[1]          # 4 * hidden_size (= 128 lane width)
    H = G // 4

    # static row offsets into the packed weight slab (all multiples of 16 -> bf16-tile aligned)
    o_whh = D
    o_fc1 = D + H
    o_fc2 = o_fc1 + H
    o_last = o_fc2 + G

    # ---- input projection for ALL time steps in one bf16 MXU pass (time-major rows) ----
    gx = jnp.dot(x_ref[...], w_ref[0:o_whh, :],
                 preferred_element_type=jnp.float32) + b_ref[0:1, :]     # (T*B, 4H) f32

    whh = w_ref[o_whh:o_fc1, :]       # (H, 4H) bf16, VMEM-resident for the whole recurrence

    def sigmoid(z):                   # tanh form -> EUP slot, no VPU divide sequence
        return 0.5 * jnp.tanh(0.5 * z) + 0.5

    def gates_to_hc(gates, c_prev, use_c):
        i_g = sigmoid(gates[:, 0 * H:1 * H])
        g_g = jnp.tanh(gates[:, 2 * H:3 * H])
        o_g = sigmoid(gates[:, 3 * H:4 * H])
        if use_c:
            f_g = sigmoid(gates[:, 1 * H:2 * H])
            c_new = f_g * c_prev + i_g * g_g
        else:                         # h = c = 0 at t == 0: skip the forget-gate path
            c_new = i_g * g_g
        return o_g * jnp.tanh(c_new), c_new

    # ---- t = 0 hoisted: no recurrent matmul; gx[0:B] is one contiguous (B, 4H) tile ----
    h, c = gates_to_hc(gx[0:B, :], None, use_c=False)

    # ---- t = 1 .. T-1: serial recurrence, fully unrolled (T small & static) ----
    for t in range(1, T):
        gates = jnp.dot(h.astype(jnp.bfloat16), whh,
                        preferred_element_type=jnp.float32) + gx[t * B:(t + 1) * B, :]
        h, c = gates_to_hc(gates, c, use_c=True)

    # ---- lane-dense MLP head (weights pre-padded to 4H = 128 lanes in prepare_params) ----
    # TODO(synk): nn.Dropout layers are identity in eval mode; no RNG masking applied.
    a = jnp.maximum(jnp.dot(h.astype(jnp.bfloat16), w_ref[o_fc1:o_fc2, :],
                            preferred_element_type=jnp.float32) + b_ref[1:2, :], 0.0)
    a = jnp.maximum(jnp.dot(a.astype(jnp.bfloat16), w_ref[o_fc2:o_last, :],
                            preferred_element_type=jnp.float32) + b_ref[2:3, :], 0.0)
    logits = jnp.dot(a.astype(jnp.bfloat16), w_ref[o_last:o_last + G, :],
                     preferred_element_type=jnp.float32) + b_ref[3:4, :]

    # softmax over the full 128-lane block; padded lanes carry a -1e30 bias -> exp underflows to 0
    m = jnp.max(logits, axis=1, keepdims=True)
    e = jnp.exp(logits - m)
    denom = jnp.sum(e, axis=1, keepdims=True)
    out_ref[...] = (e / denom).astype(out_ref.dtype)     # exact divide: rows sum to 1


# ----------------------------- one-time parameter preparation -----------------------------
def prepare_params(raw):
    """Pack PyTorch-layout params into two kernel slabs ONCE (no per-call transposes).

    raw uses PyTorch layouts: LSTM weights (4H, D)/(4H, H), Linear weights (out, in).
    Assumes 4*hidden_size is a multiple of 128 and all fc widths / class_size <= 4H.
    """
    w_ih = raw["w_ih"]            # (4H, D)
    w_hh = raw["w_hh"]            # (4H, H)
    G, _ = w_ih.shape
    H = w_hh.shape[1]
    C = raw["last_w"].shape[0]
    assert G == 4 * H and G % 128 == 0

    def pad2(a, rows, cols):
        return jnp.pad(a, ((0, rows - a.shape[0]), (0, cols - a.shape[1])))

    # --- bf16 weight slab: everything stored (in_features, out_features), lanes padded to 4H ---
    wih_t = w_ih.T                                 # (D, 4H)   gates [i, f, g, o]
    whh_t = w_hh.T                                 # (H, 4H)
    fc1_w = pad2(raw["fc1_w"].T, H, G)             # (H, 4H)
    fc2_w = pad2(raw["fc2_w"].T, G, G)             # (4H, 4H)  zero rows/cols in padding
    last_w = pad2(raw["last_w"].T, G, G)           # (4H, 4H)
    slab_w = jnp.concatenate([wih_t, whh_t, fc1_w, fc2_w, last_w], axis=0).astype(jnp.bfloat16)

    # --- f32 bias slab: padded lanes of the last layer get -1e30 so softmax -> exactly 0 ---
    b_lstm = (raw["b_ih"] + raw["b_hh"]).reshape(1, G)
    b1 = pad2(raw["fc1_b"].reshape(1, -1), 1, G)
    b2 = pad2(raw["fc2_b"].reshape(1, -1), 1, G)
    bl = jnp.full((1, G), -1e30, jnp.float32).at[0, :C].set(raw["last_b"])
    slab_b = jnp.concatenate([b_lstm, b1, b2, bl], axis=0).astype(jnp.float32)

    return slab_w, slab_b


# ----------------------------- full forward (single pallas_call) -----------------------------
@functools.partial(jax.jit, static_argnames=("num_classes",))
def lstm_model_forward(x_btd, slab_w, slab_b, *, num_classes):
    B, T, D = x_btd.shape
    G = slab_w.shape[1]
    # time-major (T*B, D): inside the kernel gx[t*B:(t+1)*B] is one contiguous (B, 4H) tile
    x_tm = jnp.transpose(x_btd, (1, 0, 2)).reshape(T * B, D).astype(jnp.bfloat16)
    out_full = pl.pallas_call(
        functools.partial(fused_lstm_head_kernel, batch=B),
        out_shape=jax.ShapeDtypeStruct((B, G), jnp.float32),
    )(x_tm, slab_w, slab_b)
    return out_full[:, :num_classes]


# ----------------------------- pure-JAX reference (for validation) -----------------------------
def reference_forward(x_btd, params):
    x_tbd = jnp.transpose(x_btd, (1, 0, 2))
    B = x_btd.shape[0]
    H = params["w_hh"].shape[1]
    wih_t = params["w_ih"].T
    whh_t = params["w_hh"].T
    b = params["b_ih"] + params["b_hh"]

    def step(carry, x_t):
        h, c = carry
        gates = x_t @ wih_t + h @ whh_t + b
        i = jax.nn.sigmoid(gates[:, 0 * H:1 * H])
        f = jax.nn.sigmoid(gates[:, 1 * H:2 * H])
        g = jnp.tanh(gates[:, 2 * H:3 * H])
        o = jax.nn.sigmoid(gates[:, 3 * H:4 * H])
        c = f * c + i * g
        h = o * jnp.tanh(c)
        return (h, c), None

    (h_n, _), _ = jax.lax.scan(step, (jnp.zeros((B, H)), jnp.zeros((B, H))), x_tbd)
    a = jnp.maximum(h_n @ params["fc1_w"].T + params["fc1_b"], 0.0)
    a = jnp.maximum(a @ params["fc2_w"].T + params["fc2_b"], 0.0)
    logits = a @ params["last_w"].T + params["last_b"]
    return jax.nn.softmax(logits, axis=1)


if __name__ == "__main__":
    # Module hyperparameters (num_layers=1, bidirectional=False, eval mode)
    B, T, D = 8, 8, 16          # input_shape = (B, T, D); input_shape[2] = D
    H = 32                      # hidden_size -> 4H = 128 (one full lane tile)
    FC1, FC2 = 64, 32           # fc_sizes = [64, 32]
    C = 10                      # class_size (>1 -> softmax)

    key = jax.random.PRNGKey(0)
    keys = jax.random.split(key, 11)
    scale = 1.0 / jnp.sqrt(H)

    # PyTorch layouts: LSTM (4H, D)/(4H, H); Linear weights (out_features, in_features)
    params = {
        "w_ih":   jax.random.uniform(keys[0], (4 * H, D),  jnp.float32, -scale, scale),
        "w_hh":   jax.random.uniform(keys[1], (4 * H, H),  jnp.float32, -scale, scale),
        "b_ih":   jax.random.uniform(keys[2], (4 * H,),    jnp.float32, -scale, scale),
        "b_hh":   jax.random.uniform(keys[3], (4 * H,),    jnp.float32, -scale, scale),
        "fc1_w":  jax.random.uniform(keys[4], (FC1, H),    jnp.float32, -scale, scale),
        "fc1_b":  jax.random.uniform(keys[5], (FC1,),      jnp.float32, -scale, scale),
        "fc2_w":  jax.random.uniform(keys[6], (FC2, FC1),  jnp.float32, -scale, scale),
        "fc2_b":  jax.random.uniform(keys[7], (FC2,),      jnp.float32, -scale, scale),
        "last_w": jax.random.uniform(keys[8], (C, FC2),    jnp.float32, -scale, scale),
        "last_b": jax.random.uniform(keys[9], (C,),        jnp.float32, -scale, scale),
    }

    slab_w, slab_b = prepare_params(params)            # one-time layout conversion / packing
    x = jax.random.normal(keys[10], (B, T, D), jnp.float32)

    out = jax.block_until_ready(lstm_model_forward(x, slab_w, slab_b, num_classes=C))
    ref = jax.block_until_ready(reference_forward(x, params))

    assert out.shape == (B, C)
    assert jnp.allclose(jnp.sum(out, axis=1), 1.0, atol=1e-4)      # exact-divide softmax
    assert jnp.allclose(out, ref, atol=1e-2, rtol=1e-2)            # bf16 MXU operands, f32 accum
    print("KERNEL_OK")
</pallas_src>

<mosaic_0001>
module attributes {stable_mosaic.version = 11 : i64} {
  func.func @fused_lstm_head_kernel(%arg0: memref<64x16xbf16, #tpu.memory_space<vmem>>, %arg1: memref<336x128xbf16, #tpu.memory_space<vmem>>, %arg2: memref<4x128xf32, #tpu.memory_space<vmem>>, %arg3: memref<8x128xf32, #tpu.memory_space<vmem>>) attributes {dimension_semantics = [], scalar_prefetch = 0 : i64, scratch_operands = 0 : i64, tpu.core_type = #tpu.core_type<tc>} {
    %c0 = arith.constant 0 : index
    %c0_0 = arith.constant 0 : index
    %0 = vector.load %arg0[%c0, %c0_0] : memref<64x16xbf16, #tpu.memory_space<vmem>>, vector<64x16xbf16>
    %c0_1 = arith.constant 0 : index
    %c0_2 = arith.constant 0 : index
    %1 = vector.load %arg1[%c0_1, %c0_2] : memref<336x128xbf16, #tpu.memory_space<vmem>>, vector<16x128xbf16>
    %cst = arith.constant dense<0.000000e+00> : vector<64x128xf32>
    %2 = tpu.matmul %0, %1, %cst {dimension_numbers = #tpu.dot_dimension_numbers<[1], [0], [0], [1], [0, 0, 1, 1], [], []>} : vector<64x16xbf16>, vector<16x128xbf16>, vector<64x128xf32> -> vector<64x128xf32>
    %c0_3 = arith.constant 0 : index
    %c0_4 = arith.constant 0 : index
    %3 = vector.load %arg2[%c0_3, %c0_4] : memref<4x128xf32, #tpu.memory_space<vmem>>, vector<1x128xf32>
    %4 = vector.broadcast %3 : vector<1x128xf32> to vector<64x128xf32>
    %5 = arith.addf %2, %4 : vector<64x128xf32>
    %c16 = arith.constant 16 : index
    %c0_5 = arith.constant 0 : index
    %6 = vector.load %arg1[%c16, %c0_5] : memref<336x128xbf16, #tpu.memory_space<vmem>>, vector<32x128xbf16>
    %7 = vector.extract_strided_slice %5 {offsets = [0, 0], sizes = [8, 128], strides = [1, 1]} : vector<64x128xf32> to vector<8x128xf32>
    %8 = vector.extract_strided_slice %7 {offsets = [0, 0], sizes = [8, 32], strides = [1, 1]} : vector<8x128xf32> to vector<8x32xf32>
    %cst_6 = arith.constant 5.000000e-01 : f32
    %9 = vector.broadcast %cst_6 : f32 to vector<8x32xf32>
    %10 = arith.mulf %9, %8 : vector<8x32xf32>
    %11 = math.tanh %10 : vector<8x32xf32>
    %cst_7 = arith.constant 5.000000e-01 : f32
    %12 = vector.broadcast %cst_7 : f32 to vector<8x32xf32>
    %13 = arith.mulf %12, %11 : vector<8x32xf32>
    %cst_8 = arith.constant 5.000000e-01 : f32
    %14 = vector.broadcast %cst_8 : f32 to vector<8x32xf32>
    %15 = arith.addf %13, %14 : vector<8x32xf32>
    %16 = vector.extract_strided_slice %7 {offsets = [0, 64], sizes = [8, 32], strides = [1, 1]} : vector<8x128xf32> to vector<8x32xf32>
    %17 = math.tanh %16 : vector<8x32xf32>
    %18 = vector.extract_strided_slice %7 {offsets = [0, 96], sizes = [8, 32], strides = [1, 1]} : vector<8x128xf32> to vector<8x32xf32>
    %cst_9 = arith.constant 5.000000e-01 : f32
    %19 = vector.broadcast %cst_9 : f32 to vector<8x32xf32>
    %20 = arith.mulf %19, %18 : vector<8x32xf32>
    %21 = math.tanh %20 : vector<8x32xf32>
    %cst_10 = arith.constant 5.000000e-01 : f32
    %22 = vector.broadcast %cst_10 : f32 to vector<8x32xf32>
    %23 = arith.mulf %22, %21 : vector<8x32xf32>
    %cst_11 = arith.constant 5.000000e-01 : f32
    %24 = vector.broadcast %cst_11 : f32 to vector<8x32xf32>
    %25 = arith.addf %23, %24 : vector<8x32xf32>
    %26 = arith.mulf %15, %17 : vector<8x32xf32>
    %27 = math.tanh %26 : vector<8x32xf32>
    %28 = arith.mulf %25, %27 : vector<8x32xf32>
    %29 = arith.truncf %28 : vector<8x32xf32> to vector<8x32xbf16>
    %cst_12 = arith.constant dense<0.000000e+00> : vector<8x128xf32>
    %30 = tpu.matmul %29, %6, %cst_12 {dimension_numbers = #tpu.dot_dimension_numbers<[1], [0], [0], [1], [0, 0, 1, 1], [], []>} : vector<8x32xbf16>, vector<32x128xbf16>, vector<8x128xf32> -> vector<8x128xf32>
    %31 = vector.extract_strided_slice %5 {offsets = [8, 0], sizes = [8, 128], strides = [1, 1]} : vector<64x128xf32> to vector<8x128xf32>
    %32 = arith.addf %30, %31 : vector<8x128xf32>
    %33 = vector.extract_strided_slice %32 {offsets = [0, 0], sizes = [8, 32], strides = [1, 1]} : vector<8x128xf32> to vector<8x32xf32>
    %cst_13 = arith.constant 5.000000e-01 : f32
    %34 = vector.broadcast %cst_13 : f32 to vector<8x32xf32>
    %35 = arith.mulf %34, %33 : vector<8x32xf32>
    %36 = math.tanh %35 : vector<8x32xf32>
    %cst_14 = arith.constant 5.000000e-01 : f32
    %37 = vector.broadcast %cst_14 : f32 to vector<8x32xf32>
    %38 = arith.mulf %37, %36 : vector<8x32xf32>
    %cst_15 = arith.constant 5.000000e-01 : f32
    %39 = vector.broadcast %cst_15 : f32 to vector<8x32xf32>
    %40 = arith.addf %38, %39 : vector<8x32xf32>
    %41 = vector.extract_strided_slice %32 {offsets = [0, 64], sizes = [8, 32], strides = [1, 1]} : vector<8x128xf32> to vector<8x32xf32>
    %42 = math.tanh %41 : vector<8x32xf32>
    %43 = vector.extract_strided_slice %32 {offsets = [0, 96], sizes = [8, 32], strides = [1, 1]} : vector<8x128xf32> to vector<8x32xf32>
    %cst_16 = arith.constant 5.000000e-01 : f32
    %44 = vector.broadcast %cst_16 : f32 to vector<8x32xf32>
    %45 = arith.mulf %44, %43 : vector<8x32xf32>
    %46 = math.tanh %45 : vector<8x32xf32>
    %cst_17 = arith.constant 5.000000e-01 : f32
    %47 = vector.broadcast %cst_17 : f32 to vector<8x32xf32>
    %48 = arith.mulf %47, %46 : vector<8x32xf32>
    %cst_18 = arith.constant 5.000000e-01 : f32
    %49 = vector.broadcast %cst_18 : f32 to vector<8x32xf32>
    %50 = arith.addf %48, %49 : vector<8x32xf32>
    %51 = vector.extract_strided_slice %32 {offsets = [0, 32], sizes = [8, 32], strides = [1, 1]} : vector<8x128xf32> to vector<8x32xf32>
    %cst_19 = arith.constant 5.000000e-01 : f32
    %52 = vector.broadcast %cst_19 : f32 to vector<8x32xf32>
    %53 = arith.mulf %52, %51 : vector<8x32xf32>
    %54 = math.tanh %53 : vector<8x32xf32>
    %cst_20 = arith.constant 5.000000e-01 : f32
    %55 = vector.broadcast %cst_20 : f32 to vector<8x32xf32>
    %56 = arith.mulf %55, %54 : vector<8x32xf32>
    %cst_21 = arith.constant 5.000000e-01 : f32
    %57 = vector.broadcast %cst_21 : f32 to vector<8x32xf32>
    %58 = arith.addf %56, %57 : vector<8x32xf32>
    %59 = arith.mulf %58, %26 : vector<8x32xf32>
    %60 = arith.mulf %40, %42 : vector<8x32xf32>
    %61 = arith.addf %59, %60 : vector<8x32xf32>
    %62 = math.tanh %61 : vector<8x32xf32>
    %63 = arith.mulf %50, %62 : vector<8x32xf32>
    %64 = arith.truncf %63 : vector<8x32xf32> to vector<8x32xbf16>
    %cst_22 = arith.constant dense<0.000000e+00> : vector<8x128xf32>
    %65 = tpu.matmul %64, %6, %cst_22 {dimension_numbers = #tpu.dot_dimension_numbers<[1], [0], [0], [1], [0, 0, 1, 1], [], []>} : vector<8x32xbf16>, vector<32x128xbf16>, vector<8x128xf32> -> vector<8x128xf32>
    %66 = vector.extract_strided_slice %5 {offsets = [16, 0], sizes = [8, 128], strides = [1, 1]} : vector<64x128xf32> to vector<8x128xf32>
    %67 = arith.addf %65, %66 : vector<8x128xf32>
    %68 = vector.extract_strided_slice %67 {offsets = [0, 0], sizes = [8, 32], strides = [1, 1]} : vector<8x128xf32> to vector<8x32xf32>
    %cst_23 = arith.constant 5.000000e-01 : f32
    %69 = vector.broadcast %cst_23 : f32 to vector<8x32xf32>
    %70 = arith.mulf %69, %68 : vector<8x32xf32>
    %71 = math.tanh %70 : vector<8x32xf32>
    %cst_24 = arith.constant 5.000000e-01 : f32
    %72 = vector.broadcast %cst_24 : f32 to vector<8x32xf32>
    %73 = arith.mulf %72, %71 : vector<8x32xf32>
    %cst_25 = arith.constant 5.000000e-01 : f32
    %74 = vector.broadcast %cst_25 : f32 to vector<8x32xf32>
    %75 = arith.addf %73, %74 : vector<8x32xf32>
    %76 = vector.extract_strided_slice %67 {offsets = [0, 64], sizes = [8, 32], strides = [1, 1]} : vector<8x128xf32> to vector<8x32xf32>
    %77 = math.tanh %76 : vector<8x32xf32>
    %78 = vector.extract_strided_slice %67 {offsets = [0, 96], sizes = [8, 32], strides = [1, 1]} : vector<8x128xf32> to vector<8x32xf32>
    %cst_26 = arith.constant 5.000000e-01 : f32
    %79 = vector.broadcast %cst_26 : f32 to vector<8x32xf32>
    %80 = arith.mulf %79, %78 : vector<8x32xf32>
    %81 = math.tanh %80 : vector<8x32xf32>
    %cst_27 = arith.constant 5.000000e-01 : f32
    %82 = vector.broadcast %cst_27 : f32 to vector<8x32xf32>
    %83 = arith.mulf %82, %81 : vector<8x32xf32>
    %cst_28 = arith.constant 5.000000e-01 : f32
    %84 = vector.broadcast %cst_28 : f32 to vector<8x32xf32>
    %85 = arith.addf %83, %84 : vector<8x32xf32>
    %86 = vector.extract_strided_slice %67 {offsets = [0, 32], sizes = [8, 32], strides = [1, 1]} : vector<8x128xf32> to vector<8x32xf32>
    %cst_29 = arith.constant 5.000000e-01 : f32
    %87 = vector.broadcast %cst_29 : f32 to vector<8x32xf32>
    %88 = arith.mulf %87, %86 : vector<8x32xf32>
    %89 = math.tanh %88 : vector<8x32xf32>
    %cst_30 = arith.constant 5.000000e-01 : f32
    %90 = vector.broadcast %cst_30 : f32 to vector<8x32xf32>
    %91 = arith.mulf %90, %89 : vector<8x32xf32>
    %cst_31 = arith.constant 5.000000e-01 : f32
    %92 = vector.broadcast %cst_31 : f32 to vector<8x32xf32>
    %93 = arith.addf %91, %92 : vector<8x32xf32>
    %94 = arith.mulf %93, %61 : vector<8x32xf32>
    %95 = arith.mulf %75, %77 : vector<8x32xf32>
    %96 = arith.addf %94, %95 : vector<8x32xf32>
    %97 = math.tanh %96 : vector<8x32xf32>
    %98 = arith.mulf %85, %97 : vector<8x32xf32>
    %99 = arith.truncf %98 : vector<8x32xf32> to vector<8x32xbf16>
    %cst_32 = arith.constant dense<0.000000e+00> : vector<8x128xf32>
    %100 = tpu.matmul %99, %6, %cst_32 {dimension_numbers = #tpu.dot_dimension_numbers<[1], [0], [0], [1], [0, 0, 1, 1], [], []>} : vector<8x32xbf16>, vector<32x128xbf16>, vector<8x128xf32> -> vector<8x128xf32>
    %101 = vector.extract_strided_slice %5 {offsets = [24, 0], sizes = [8, 128], strides = [1, 1]} : vector<64x128xf32> to vector<8x128xf32>
    %102 = arith.addf %100, %101 : vector<8x128xf32>
    %103 = vector.extract_strided_slice %102 {offsets = [0, 0], sizes = [8, 32], strides = [1, 1]} : vector<8x128xf32> to vector<8x32xf32>
    %cst_33 = arith.constant 5.000000e-01 : f32
    %104 = vector.broadcast %cst_33 : f32 to vector<8x32xf32>
    %105 = arith.mulf %104, %103 : vector<8x32xf32>
    %106 = math.tanh %105 : vector<8x32xf32>
    %cst_34 = arith.constant 5.000000e-01 : f32
    %107 = vector.broadcast %cst_34 : f32 to vector<8x32xf32>
    %108 = arith.mulf %107, %106 : vector<8x32xf32>
    %cst_35 = arith.constant 5.000000e-01 : f32
    %109 = vector.broadcast %cst_35 : f32 to vector<8x32xf32>
    %110 = arith.addf %108, %109 : vector<8x32xf32>
    %111 = vector.extract_strided_slice %102 {offsets = [0, 64], sizes = [8, 32], strides = [1, 1]} : vector<8x128xf32> to vector<8x32xf32>
    %112 = math.tanh %111 : vector<8x32xf32>
    %113 = vector.extract_strided_slice %102 {offsets = [0, 96], sizes = [8, 32], strides = [1, 1]} : vector<8x128xf32> to vector<8x32xf32>
    %cst_36 = arith.constant 5.000000e-01 : f32
    %114 = vector.broadcast %cst_36 : f32 to vector<8x32xf32>
    %115 = arith.mulf %114, %113 : vector<8x32xf32>
    %116 = math.tanh %115 : vector<8x32xf32>
    %cst_37 = arith.constant 5.000000e-01 : f32
    %117 = vector.broadcast %cst_37 : f32 to vector<8x32xf32>
    %118 = arith.mulf %117, %116 : vector<8x32xf32>
    %cst_38 = arith.constant 5.000000e-01 : f32
    %119 = vector.broadcast %cst_38 : f32 to vector<8x32xf32>
    %120 = arith.addf %118, %119 : vector<8x32xf32>
    %121 = vector.extract_strided_slice %102 {offsets = [0, 32], sizes = [8, 32], strides = [1, 1]} : vector<8x128xf32> to vector<8x32xf32>
    %cst_39 = arith.constant 5.000000e-01 : f32
    %122 = vector.broadcast %cst_39 : f32 to vector<8x32xf32>
    %123 = arith.mulf %122, %121 : vector<8x32xf32>
    %124 = math.tanh %123 : vector<8x32xf32>
    %cst_40 = arith.constant 5.000000e-01 : f32
    %125 = vector.broadcast %cst_40 : f32 to vector<8x32xf32>
    %126 = arith.mulf %125, %124 : vector<8x32xf32>
    %cst_41 = arith.constant 5.000000e-01 : f32
    %127 = vector.broadcast %cst_41 : f32 to vector<8x32xf32>
    %128 = arith.addf %126, %127 : vector<8x32xf32>
    %129 = arith.mulf %128, %96 : vector<8x32xf32>
    %130 = arith.mulf %110, %112 : vector<8x32xf32>
    %131 = arith.addf %129, %130 : vector<8x32xf32>
    %132 = math.tanh %131 : vector<8x32xf32>
    %133 = arith.mulf %120, %132 : vector<8x32xf32>
    %134 = arith.truncf %133 : vector<8x32xf32> to vector<8x32xbf16>
    %cst_42 = arith.constant dense<0.000000e+00> : vector<8x128xf32>
    %135 = tpu.matmul %134, %6, %cst_42 {dimension_numbers = #tpu.dot_dimension_numbers<[1], [0], [0], [1], [0, 0, 1, 1], [], []>} : vector<8x32xbf16>, vector<32x128xbf16>, vector<8x128xf32> -> vector<8x128xf32>
    %136 = vector.extract_strided_slice %5 {offsets = [32, 0], sizes = [8, 128], strides = [1, 1]} : vector<64x128xf32> to vector<8x128xf32>
    %137 = arith.addf %135, %136 : vector<8x128xf32>
    %138 = vector.extract_strided_slice %137 {offsets = [0, 0], sizes = [8, 32], strides = [1, 1]} : vector<8x128xf32> to vector<8x32xf32>
    %cst_43 = arith.constant 5.000000e-01 : f32
    %139 = vector.broadcast %cst_43 : f32 to vector<8x32xf32>
    %140 = arith.mulf %139, %138 : vector<8x32xf32>
    %141 = math.tanh %140 : vector<8x32xf32>
    %cst_44 = arith.constant 5.000000e-01 : f32
    %142 = vector.broadcast %cst_44 : f32 to vector<8x32xf32>
    %143 = arith.mulf %142, %141 : vector<8x32xf32>
    %cst_45 = arith.constant 5.000000e-01 : f32
    %144 = vector.broadcast %cst_45 : f32 to vector<8x32xf32>
    %145 = arith.addf %143, %144 : vector<8x32xf32>
    %146 = vector.extract_strided_slice %137 {offsets = [0, 64], sizes = [8, 32], strides = [1, 1]} : vector<8x128xf32> to vector<8x32xf32>
    %147 = math.tanh %146 : vector<8x32xf32>
    %148 = vector.extract_strided_slice %137 {offsets = [0, 96], sizes = [8, 32], strides = [1, 1]} : vector<8x128xf32> to vector<8x32xf32>
    %cst_46 = arith.constant 5.000000e-01 : f32
    %149 = vector.broadcast %cst_46 : f32 to vector<8x32xf32>
    %150 = arith.mulf %149, %148 : vector<8x32xf32>
    %151 = math.tanh %150 : vector<8x32xf32>
    %cst_47 = arith.constant 5.000000e-01 : f32
    %152 = vector.broadcast %cst_47 : f32 to vector<8x32xf32>
    %153 = arith.mulf %152, %151 : vector<8x32xf32>
    %cst_48 = arith.constant 5.000000e-01 : f32
    %154 = vector.broadcast %cst_48 : f32 to vector<8x32xf32>
    %155 = arith.addf %153, %154 : vector<8x32xf32>
    %156 = vector.extract_strided_slice %137 {offsets = [0, 32], sizes = [8, 32], strides = [1, 1]} : vector<8x128xf32> to vector<8x32xf32>
    %cst_49 = arith.constant 5.000000e-01 : f32
    %157 = vector.broadcast %cst_49 : f32 to vector<8x32xf32>
    %158 = arith.mulf %157, %156 : vector<8x32xf32>
    %159 = math.tanh %158 : vector<8x32xf32>
    %cst_50 = arith.constant 5.000000e-01 : f32
    %160 = vector.broadcast %cst_50 : f32 to vector<8x32xf32>
    %161 = arith.mulf %160, %159 : vector<8x32xf32>
    %cst_51 = arith.constant 5.000000e-01 : f32
    %162 = vector.broadcast %cst_51 : f32 to vector<8x32xf32>
    %163 = arith.addf %161, %162 : vector<8x32xf32>
    %164 = arith.mulf %163, %131 : vector<8x32xf32>
    %165 = arith.mulf %145, %147 : vector<8x32xf32>
    %166 = arith.addf %164, %165 : vector<8x32xf32>
    %167 = math.tanh %166 : vector<8x32xf32>
    %168 = arith.mulf %155, %167 : vector<8x32xf32>
    %169 = arith.truncf %168 : vector<8x32xf32> to vector<8x32xbf16>
    %cst_52 = arith.constant dense<0.000000e+00> : vector<8x128xf32>
    %170 = tpu.matmul %169, %6, %cst_52 {dimension_numbers = #tpu.dot_dimension_numbers<[1], [0], [0], [1], [0, 0, 1, 1], [], []>} : vector<8x32xbf16>, vector<32x128xbf16>, vector<8x128xf32> -> vector<8x128xf32>
    %171 = vector.extract_strided_slice %5 {offsets = [40, 0], sizes = [8, 128], strides = [1, 1]} : vector<64x128xf32> to vector<8x128xf32>
    %172 = arith.addf %170, %171 : vector<8x128xf32>
    %173 = vector.extract_strided_slice %172 {offsets = [0, 0], sizes = [8, 32], strides = [1, 1]} : vector<8x128xf32> to vector<8x32xf32>
    %cst_53 = arith.constant 5.000000e-01 : f32
    %174 = vector.broadcast %cst_53 : f32 to vector<8x32xf32>
    %175 = arith.mulf %174, %173 : vector<8x32xf32>
    %176 = math.tanh %175 : vector<8x32xf32>
    %cst_54 = arith.constant 5.000000e-01 : f32
    %177 = vector.broadcast %cst_54 : f32 to vector<8x32xf32>
    %178 = arith.mulf %177, %176 : vector<8x32xf32>
    %cst_55 = arith.constant 5.000000e-01 : f32
    %179 = vector.broadcast %cst_55 : f32 to vector<8x32xf32>
    %180 = arith.addf %178, %179 : vector<8x32xf32>
    %181 = vector.extract_strided_slice %172 {offsets = [0, 64], sizes = [8, 32], strides = [1, 1]} : vector<8x128xf32> to vector<8x32xf32>
    %182 = math.tanh %181 : vector<8x32xf32>
    %183 = vector.extract_strided_slice %172 {offsets = [0, 96], sizes = [8, 32], strides = [1, 1]} : vector<8x128xf32> to vector<8x32xf32>
    %cst_56 = arith.constant 5.000000e-01 : f32
    %184 = vector.broadcast %cst_56 : f32 to vector<8x32xf32>
    %185 = arith.mulf %184, %183 : vector<8x32xf32>
    %186 = math.tanh %185 : vector<8x32xf32>
    %cst_57 = arith.constant 5.000000e-01 : f32
    %187 = vector.broadcast %cst_57 : f32 to vector<8x32xf32>
    %188 = arith.mulf %187, %186 : vector<8x32xf32>
    %cst_58 = arith.constant 5.000000e-01 : f32
    %189 = vector.broadcast %cst_58 : f32 to vector<8x32xf32>
    %190 = arith.addf %188, %189 : vector<8x32xf32>
    %191 = vector.extract_strided_slice %172 {offsets = [0, 32], sizes = [8, 32], strides = [1, 1]} : vector<8x128xf32> to vector<8x32xf32>
    %cst_59 = arith.constant 5.000000e-01 : f32
    %192 = vector.broadcast %cst_59 : f32 to vector<8x32xf32>
    %193 = arith.mulf %192, %191 : vector<8x32xf32>
    %194 = math.tanh %193 : vector<8x32xf32>
    %cst_60 = arith.constant 5.000000e-01 : f32
    %195 = vector.broadcast %cst_60 : f32 to vector<8x32xf32>
    %196 = arith.mulf %195, %194 : vector<8x32xf32>
    %cst_61 = arith.constant 5.000000e-01 : f32
    %197 = vector.broadcast %cst_61 : f32 to vector<8x32xf32>
    %198 = arith.addf %196, %197 : vector<8x32xf32>
    %199 = arith.mulf %198, %166 : vector<8x32xf32>
    %200 = arith.mulf %180, %182 : vector<8x32xf32>
    %201 = arith.addf %199, %200 : vector<8x32xf32>
    %202 = math.tanh %201 : vector<8x32xf32>
    %203 = arith.mulf %190, %202 : vector<8x32xf32>
    %204 = arith.truncf %203 : vector<8x32xf32> to vector<8x32xbf16>
    %cst_62 = arith.constant dense<0.000000e+00> : vector<8x128xf32>
    %205 = tpu.matmul %204, %6, %cst_62 {dimension_numbers = #tpu.dot_dimension_numbers<[1], [0], [0], [1], [0, 0, 1, 1], [], []>} : vector<8x32xbf16>, vector<32x128xbf16>, vector<8x128xf32> -> vector<8x128xf32>
    %206 = vector.extract_strided_slice %5 {offsets = [48, 0], sizes = [8, 128], strides = [1, 1]} : vector<64x128xf32> to vector<8x128xf32>
    %207 = arith.addf %205, %206 : vector<8x128xf32>
    %208 = vector.extract_strided_slice %207 {offsets = [0, 0], sizes = [8, 32], strides = [1, 1]} : vector<8x128xf32> to vector<8x32xf32>
    %cst_63 = arith.constant 5.000000e-01 : f32
    %209 = vector.broadcast %cst_63 : f32 to vector<8x32xf32>
    %210 = arith.mulf %209, %208 : vector<8x32xf32>
    %211 = math.tanh %210 : vector<8x32xf32>
    %cst_64 = arith.constant 5.000000e-01 : f32
    %212 = vector.broadcast %cst_64 : f32 to vector<8x32xf32>
    %213 = arith.mulf %212, %211 : vector<8x32xf32>
    %cst_65 = arith.constant 5.000000e-01 : f32
    %214 = vector.broadcast %cst_65 : f32 to vector<8x32xf32>
    %215 = arith.addf %213, %214 : vector<8x32xf32>
    %216 = vector.extract_strided_slice %207 {offsets = [0, 64], sizes = [8, 32], strides = [1, 1]} : vector<8x128xf32> to vector<8x32xf32>
    %217 = math.tanh %216 : vector<8x32xf32>
    %218 = vector.extract_strided_slice %207 {offsets = [0, 96], sizes = [8, 32], strides = [1, 1]} : vector<8x128xf32> to vector<8x32xf32>
    %cst_66 = arith.constant 5.000000e-01 : f32
    %219 = vector.broadcast %cst_66 : f32 to vector<8x32xf32>
    %220 = arith.mulf %219, %218 : vector<8x32xf32>
    %221 = math.tanh %220 : vector<8x32xf32>
    %cst_67 = arith.constant 5.000000e-01 : f32
    %222 = vector.broadcast %cst_67 : f32 to vector<8x32xf32>
    %223 = arith.mulf %222, %221 : vector<8x32xf32>
    %cst_68 = arith.constant 5.000000e-01 : f32
    %224 = vector.broadcast %cst_68 : f32 to vector<8x32xf32>
    %225 = arith.addf %223, %224 : vector<8x32xf32>
    %226 = vector.extract_strided_slice %207 {offsets = [0, 32], sizes = [8, 32], strides = [1, 1]} : vector<8x128xf32> to vector<8x32xf32>
    %cst_69 = arith.constant 5.000000e-01 : f32
    %227 = vector.broadcast %cst_69 : f32 to vector<8x32xf32>
    %228 = arith.mulf %227, %226 : vector<8x32xf32>
    %229 = math.tanh %228 : vector<8x32xf32>
    %cst_70 = arith.constant 5.000000e-01 : f32
    %230 = vector.broadcast %cst_70 : f32 to vector<8x32xf32>
    %231 = arith.mulf %230, %229 : vector<8x32xf32>
    %cst_71 = arith.constant 5.000000e-01 : f32
    %232 = vector.broadcast %cst_71 : f32 to vector<8x32xf32>
    %233 = arith.addf %231, %232 : vector<8x32xf32>
    %234 = arith.mulf %233, %201 : vector<8x32xf32>
    %235 = arith.mulf %215, %217 : vector<8x32xf32>
    %236 = arith.addf %234, %235 : vector<8x32xf32>
    %237 = math.tanh %236 : vector<8x32xf32>
    %238 = arith.mulf %225, %237 : vector<8x32xf32>
    %239 = arith.truncf %238 : vector<8x32xf32> to vector<8x32xbf16>
    %cst_72 = arith.constant dense<0.000000e+00> : vector<8x128xf32>
    %240 = tpu.matmul %239, %6, %cst_72 {dimension_numbers = #tpu.dot_dimension_numbers<[1], [0], [0], [1], [0, 0, 1, 1], [], []>} : vector<8x32xbf16>, vector<32x128xbf16>, vector<8x128xf32> -> vector<8x128xf32>
    %241 = vector.extract_strided_slice %5 {offsets = [56, 0], sizes = [8, 128], strides = [1, 1]} : vector<64x128xf32> to vector<8x128xf32>
    %242 = arith.addf %240, %241 : vector<8x128xf32>
    %243 = vector.extract_strided_slice %242 {offsets = [0, 0], sizes = [8, 32], strides = [1, 1]} : vector<8x128xf32> to vector<8x32xf32>
    %cst_73 = arith.constant 5.000000e-01 : f32
    %244 = vector.broadcast %cst_73 : f32 to vector<8x32xf32>
    %245 = arith.mulf %244, %243 : vector<8x32xf32>
    %246 = math.tanh %245 : vector<8x32xf32>
    %cst_74 = arith.constant 5.000000e-01 : f32
    %247 = vector.broadcast %cst_74 : f32 to vector<8x32xf32>
    %248 = arith.mulf %247, %246 : vector<8x32xf32>
    %cst_75 = arith.constant 5.000000e-01 : f32
    %249 = vector.broadcast %cst_75 : f32 to vector<8x32xf32>
    %250 = arith.addf %248, %249 : vector<8x32xf32>
    %251 = vector.extract_strided_slice %242 {offsets = [0, 64], sizes = [8, 32], strides = [1, 1]} : vector<8x128xf32> to vector<8x32xf32>
    %252 = math.tanh %251 : vector<8x32xf32>
    %253 = vector.extract_strided_slice %242 {offsets = [0, 96], sizes = [8, 32], strides = [1, 1]} : vector<8x128xf32> to vector<8x32xf32>
    %cst_76 = arith.constant 5.000000e-01 : f32
    %254 = vector.broadcast %cst_76 : f32 to vector<8x32xf32>
    %255 = arith.mulf %254, %253 : vector<8x32xf32>
    %256 = math.tanh %255 : vector<8x32xf32>
    %cst_77 = arith.constant 5.000000e-01 : f32
    %257 = vector.broadcast %cst_77 : f32 to vector<8x32xf32>
    %258 = arith.mulf %257, %256 : vector<8x32xf32>
    %cst_78 = arith.constant 5.000000e-01 : f32
    %259 = vector.broadcast %cst_78 : f32 to vector<8x32xf32>
    %260 = arith.addf %258, %259 : vector<8x32xf32>
    %261 = vector.extract_strided_slice %242 {offsets = [0, 32], sizes = [8, 32], strides = [1, 1]} : vector<8x128xf32> to vector<8x32xf32>
    %cst_79 = arith.constant 5.000000e-01 : f32
    %262 = vector.broadcast %cst_79 : f32 to vector<8x32xf32>
    %263 = arith.mulf %262, %261 : vector<8x32xf32>
    %264 = math.tanh %263 : vector<8x32xf32>
    %cst_80 = arith.constant 5.000000e-01 : f32
    %265 = vector.broadcast %cst_80 : f32 to vector<8x32xf32>
    %266 = arith.mulf %265, %264 : vector<8x32xf32>
    %cst_81 = arith.constant 5.000000e-01 : f32
    %267 = vector.broadcast %cst_81 : f32 to vector<8x32xf32>
    %268 = arith.addf %266, %267 : vector<8x32xf32>
    %269 = arith.mulf %268, %236 : vector<8x32xf32>
    %270 = arith.mulf %250, %252 : vector<8x32xf32>
    %271 = arith.addf %269, %270 : vector<8x32xf32>
    %272 = math.tanh %271 : vector<8x32xf32>
    %273 = arith.mulf %260, %272 : vector<8x32xf32>
    %274 = arith.truncf %273 : vector<8x32xf32> to vector<8x32xbf16>
    %c48 = arith.constant 48 : index
    %c0_82 = arith.constant 0 : index
    %275 = vector.load %arg1[%c48, %c0_82] : memref<336x128xbf16, #tpu.memory_space<vmem>>, vector<32x128xbf16>
    %cst_83 = arith.constant dense<0.000000e+00> : vector<8x128xf32>
    %276 = tpu.matmul %274, %275, %cst_83 {dimension_numbers = #tpu.dot_dimension_numbers<[1], [0], [0], [1], [0, 0, 1, 1], [], []>} : vector<8x32xbf16>, vector<32x128xbf16>, vector<8x128xf32> -> vector<8x128xf32>
    %c1 = arith.constant 1 : index
    %c0_84 = arith.constant 0 : index
    %277 = vector.load %arg2[%c1, %c0_84] : memref<4x128xf32, #tpu.memory_space<vmem>>, vector<1x128xf32>
    %278 = vector.broadcast %277 : vector<1x128xf32> to vector<8x128xf32>
    %279 = arith.addf %276, %278 : vector<8x128xf32>
    %cst_85 = arith.constant 0.000000e+00 : f32
    %280 = vector.broadcast %cst_85 : f32 to vector<8x128xf32>
    %281 = arith.maximumf %279, %280 : vector<8x128xf32>
    %282 = arith.truncf %281 : vector<8x128xf32> to vector<8x128xbf16>
    %c80 = arith.constant 80 : index
    %c0_86 = arith.constant 0 : index
    %283 = vector.load %arg1[%c80, %c0_86] : memref<336x128xbf16, #tpu.memory_space<vmem>>, vector<128x128xbf16>
    %cst_87 = arith.constant dense<0.000000e+00> : vector<8x128xf32>
    %284 = tpu.matmul %282, %283, %cst_87 {dimension_numbers = #tpu.dot_dimension_numbers<[1], [0], [0], [1], [0, 0, 1, 1], [], []>} : vector<8x128xbf16>, vector<128x128xbf16>, vector<8x128xf32> -> vector<8x128xf32>
    %c2 = arith.constant 2 : index
    %c0_88 = arith.constant 0 : index
    %285 = vector.load %arg2[%c2, %c0_88] : memref<4x128xf32, #tpu.memory_space<vmem>>, vector<1x128xf32>
    %286 = vector.broadcast %285 : vector<1x128xf32> to vector<8x128xf32>
    %287 = arith.addf %284, %286 : vector<8x128xf32>
    %cst_89 = arith.constant 0.000000e+00 : f32
    %288 = vector.broadcast %cst_89 : f32 to vector<8x128xf32>
    %289 = arith.maximumf %287, %288 : vector<8x128xf32>
    %290 = arith.truncf %289 : vector<8x128xf32> to vector<8x128xbf16>
    %c208 = arith.constant 208 : index
    %c0_90 = arith.constant 0 : index
    %291 = vector.load %arg1[%c208, %c0_90] : memref<336x128xbf16, #tpu.memory_space<vmem>>, vector<128x128xbf16>
    %cst_91 = arith.constant dense<0.000000e+00> : vector<8x128xf32>
    %292 = tpu.matmul %290, %291, %cst_91 {dimension_numbers = #tpu.dot_dimension_numbers<[1], [0], [0], [1], [0, 0, 1, 1], [], []>} : vector<8x128xbf16>, vector<128x128xbf16>, vector<8x128xf32> -> vector<8x128xf32>
    %c3 = arith.constant 3 : index
    %c0_92 = arith.constant 0 : index
    %293 = vector.load %arg2[%c3, %c0_92] : memref<4x128xf32, #tpu.memory_space<vmem>>, vector<1x128xf32>
    %294 = vector.broadcast %293 : vector<1x128xf32> to vector<8x128xf32>
    %295 = arith.addf %292, %294 : vector<8x128xf32>
    %cst_93 = arith.constant dense<0xFF800000> : vector<8xf32>
    %296 = vector.multi_reduction <maximumf>, %295, %cst_93 [1] : vector<8x128xf32> to vector<8xf32>
    %297 = vector.shape_cast %296 : vector<8xf32> to vector<8x1xf32>
    %298 = vector.broadcast %297 : vector<8x1xf32> to vector<8x128xf32>
    %299 = arith.subf %295, %298 : vector<8x128xf32>
    %300 = math.exp %299 : vector<8x128xf32>
    %cst_94 = arith.constant dense<0.000000e+00> : vector<8xf32>
    %301 = vector.multi_reduction <add>, %300, %cst_94 [1] : vector<8x128xf32> to vector<8xf32>
    %302 = vector.shape_cast %301 : vector<8xf32> to vector<8x1xf32>
    %303 = vector.broadcast %302 : vector<8x1xf32> to vector<8x128xf32>
    %304 = arith.divf %300, %303 : vector<8x128xf32>
    %c0_95 = arith.constant 0 : index
    %c0_96 = arith.constant 0 : index
    %305 = vector.load %arg3[%c0_95, %c0_96] : memref<8x128xf32, #tpu.memory_space<vmem>>, vector<8x128xf32>
    tpu.vector_store %arg3[%c0_95, %c0_96], %304 {strides = array<i32>} : memref<8x128xf32, #tpu.memory_space<vmem>>, vector<8x128xf32>,
    return
  }
}

</mosaic_0001>

<bundles_post_ra>
// kernel: lstm_model_forward.1
= control target key start
LH: loop header
LB: loop body
LE: loop exit
PB: predicated region body
PF: predicated region fallthrough
CT: control target
= control target key end

     0   :  { %8 = vsyncpa [#allocation3], 0  ;;  %s1052_s0 = inlined_call_operand.vmem [shape: bf16[64,16], index: 0, kind: input, shape index: {}]   ;;  %s1053_s1 = inlined_call_operand.hbm [shape: bf16[336,128], index: 1, kind: input, shape index: {}]   ;;  %s1054_s2 = inlined_call_operand.vmem [shape: f32[4,128], index: 2, kind: input, shape index: {}]   ;;  %s1055_s3 = inlined_call_operand.hbm [shape: f32[8,128], index: 3, kind: output, shape index: {}]  }
   0x1   :  { %9 = vsyncpa [#allocation4], 0  ;;  %s16_s14 = sshll.u32 %s1053_s1, 4  ;;  %s935_s15 = smov [#allocation2]   ;;  %s17_s14 = int_to_ptr.hbm [resolvable:$true] %s16_s14 }
   0x2   :  { %s18_s16 = sshll.u32 %s935_s15, 4  ;;  %s936_s17 = smov 64   ;;  %s19_s16 = int_to_ptr.vmem [resolvable:$true] %s18_s16 }
   0x3   :  { %s937_s18 = smov 4  }
   0x4   :  { %24 = dma.hbm_to_vmem [thread:$0]  %s17_s14, 2688, %s19_s16, [#allocation3], %s936_s17, %s936_s17, %s937_s18  }
   0x5   :  { %931 = dma.done.wait [#allocation3], 2688  }
   0x6   :  { %932 = vsyncadd [#allocation3], 4294964608  ;;  %v799_v0 = vld [vmem:[#allocation2] sm:$0xff]  ;;  %vm70_vm0 = vcmask 130048   ;;  %s938_s22 = smov 32   ;;  %s939_s23 = smov 96  }
   0x7   :  { %v795_v1 = vld [vmem:[%s1052_s0] sm:$0xff]  ;;  %90 = vmatpush.bf16.msra.mxu0 %v799_v0  ;;  %820 = vmatpush.bf16.msra.mxu1 %v799_v0  ;;  %v798_v13 = vld [vmem:[%s1052_s0 + $0x18] sm:$0xff]  ;;  %v801_v14 = vld [vmem:[#allocation2 + $0x10] sm:$0xff]  ;;  %vm148_vm1 = vcmask 261120   ;;  %s673_s11 = sshll.u32 %s1055_s3, 4  ;;  %s674_s11 = int_to_ptr.hbm [resolvable:$true] %s673_s11 }
   0x8   :  { %v973_v2 = vld [vmem:[%s1054_s2] ss:$0 sm:$0xff]  ;;  %204 = vmatpush.bf16.msra.mxu2 %v801_v14  ;;  %v800_v15 = vld [vmem:[#allocation2 + $0x8] sm:$0xff]  ;;  %246 = vmatpush.bf16.msra.mxu3 %v801_v14 }
   0x9   :  { %v796_v39 = vld [vmem:[%s1052_s0 + $0x8] sm:$0xff] }
   0xa   :  { %703 = vmatmul.msk.bf16.vlgmr.msra.gmra.mxu0 %vm70_vm0, %v795_v1  ;;  %706 = vmatmul.msk.bf16.vlgmr.msra.gmra.mxu1 %vm70_vm0, %v798_v13 }
   0xb   :  { %158 = vmatpush.bf16.msrb.mxu1 %v801_v14 }
   0xc   :  { %205 = vmatpush.bf16.msra.mxu2 %v800_v15  ;;  %247 = vmatpush.bf16.msra.mxu3 %v800_v15 }
   0xf   :  { %159 = vmatpush.bf16.msrb.mxu1 %v800_v15 }
  0x10   :  { %330 = vmatpush.bf16.msrb.mxu2 %v801_v14  ;;  %372 = vmatpush.bf16.msrb.mxu3 %v801_v14 }
  0x13   :  { %288 = vmatpush.bf16.msra.mxu1 %v801_v14 }
  0x14   :  { %331 = vmatpush.bf16.msrb.mxu2 %v800_v15  ;;  %373 = vmatpush.bf16.msrb.mxu3 %v800_v15 }
  0x17   :  { %289 = vmatpush.bf16.msra.mxu1 %v800_v15 }
  0x1a   :  { %704 = vmatmul.msk.bf16.gmra.mxu0 %vm70_vm0, %v796_v39 }
  0x87   :  { %v92_v3 = vpop.f32.mrf.mxu0  ;;  %v984_v20 = vpop.f32.mrf.mxu1 }
  0x88   :  { %v93_v4 = vadd.f32 %v973_v2, %v92_v3 }
  0x8a   :  { %831 = vtanh.f32 %v93_v4  ;;  %v116_v6 = vmul.f32 0.5, %v93_v4 }
  0x8c   :  { %833 = vtanh.f32 %v116_v6 }
  0x8f   :  { %v986_v21 = vpop.f32.mrf.mxu1  ;;  %v94_v22 = vpop.f32.mrf.mxu0 }
  0x90   :  { %v832_v5 = vpop.eup %831  ;;  %v95_v23 = vadd.f32 %v973_v2, %v94_v22 }
  0x91   :  { %122 = vrot.lane.b32.xlu0 %v832_v5, %s936_s17 }
  0x92   :  { %v834_v7 = vpop.eup %833 }
  0x93   :  { %v118_v8 = vmul.f32 0.5, %v834_v7 }
  0x95   :  { %v119_v9 = vadd.f32 0.5, %v118_v8 }
  0x97   :  { %v97_v44 = vpop.f32.mrf.mxu0 }
  0x98   :  { %v98_v45 = vadd.f32 %v973_v2, %v97_v44 }
  0x9f   :  { %v99_v0 = vpop.f32.mrf.mxu0 }
  0xa0   :  { %v100_v1 = vadd.f32 %v973_v2, %v99_v0  ;;  %v108_v0 = vadd.f32 %v973_v2, %v984_v20 }
 0x103   :  { %v123_v10 = vpop.permute.xlu0 %122 }
 0x104   :  { %v125_v11 = vmul.f32 %v123_v10, %v119_v9 }
 0x106   :  { %835 = vtanh.f32 %v125_v11  ;;  %171 = vrot.lane.b32.xlu2 %v125_v11, %s938_s22 }
 0x10c   :  { %v836_v12 = vpop.eup %835 }
 0x10d   :  { %128 = vrot.lane.b32.xlu0 %v836_v12, %s939_s23 }
 0x160   :  { %v172_v34 = vpop.permute.xlu2 %171 }
 0x17f   :  { %v129_v16 = vpop.permute.xlu0 %128 }
 0x180   :  { %v131_v17 = vmul.f32 %v129_v16, %v119_v9 }
 0x182   :  { %v132_v18 = vpack.c.bf16 %v131_v17, %v131_v17  ;;  %v797_v17 = vld [vmem:[%s1052_s0 + $0x10] sm:$0xff] }
 0x183   :  { %705 = vmatmul.msk.bf16.gmra.mxu0 %vm70_vm0, %v797_v17 }
 0x184   :  { %134 = vrot.lane.b32.xlu1 %v132_v18, %s938_s22 }
 0x1f6   :  { %v135_v19 = vpop.permute.xlu1 %134 }
 0x1f7   :  { %715 = vmatmul.msk.bf16.vlgmr.msrb.gmra.mxu1 %vm148_vm1, %v135_v19 }
 0x1f8   :  { %414 = vmatpush.bf16.msrb.mxu1 %v801_v14 }
 0x1fc   :  { %415 = vmatpush.bf16.msrb.mxu1 %v800_v15 }
 0x274   :  { %v161_v24 = vpop.f32.mrf.mxu1 }
 0x275   :  { %v162_v25 = vadd.f32 %v161_v24, %v95_v23  ;;  %v102_v24 = vpop.f32.mrf.mxu0 }
 0x277   :  { %837 = vtanh.f32 %v162_v25  ;;  %v165_v28 = vmul.f32 0.5, %v162_v25  ;;  %v103_v25 = vadd.f32 %v973_v2, %v102_v24 }
 0x279   :  { %839 = vtanh.f32 %v165_v28 }
 0x27c   :  { %v163_v26 = vpop.f32.mrf.mxu1 }
 0x27d   :  { %v838_v27 = vpop.eup %837  ;;  %v104_v44 = vpop.f32.mrf.mxu0 }
 0x27e   :  { %176 = vrot.lane.b32.xlu1 %v838_v27, %s936_s17 }
 0x27f   :  { %v840_v29 = vpop.eup %839 }
 0x280   :  { %v167_v30 = vmul.f32 0.5, %v840_v29 }
 0x282   :  { %v168_v31 = vadd.f32 0.5, %v167_v30 }
 0x284   :  { %v174_v35 = vmul.f32 %v172_v34, %v168_v31 }
 0x2f0   :  { %v177_v32 = vpop.permute.xlu1 %176 }
 0x2f1   :  { %v179_v33 = vmul.f32 %v177_v32, %v168_v31 }
 0x2f3   :  { %181 = vrot.lane.b32.xlu2 %v179_v33, %s938_s22 }
 0x34d   :  { %v182_v36 = vpop.permute.xlu2 %181 }
 0x34e   :  { %v184_v37 = vadd.f32 %v182_v36, %v174_v35 }
 0x350   :  { %841 = vtanh.f32 %v184_v37 }
 0x356   :  { %v842_v38 = vpop.eup %841 }
 0x357   :  { %187 = vrot.lane.b32.xlu0 %v842_v38, %s936_s17 }
 0x3c9   :  { %v188_v40 = vpop.permute.xlu0 %187 }
 0x3ca   :  { %v190_v41 = vmul.f32 %v188_v40, %v168_v31 }
 0x3cc   :  { %v191_v42 = vpack.c.bf16 %v190_v41, %v190_v41 }
 0x3ce   :  { %193 = vrot.lane.b32.xlu1 %v191_v42, %s938_s22 }
 0x440   :  { %v194_v43 = vpop.permute.xlu1 %193 }
 0x441   :  { %716 = vmatmul.msk.bf16.vlgmr.msra.gmra.mxu2 %vm148_vm1, %v194_v43 }
 0x4c4   :  { %v207_v46 = vpop.f32.mrf.mxu2 }
 0x4c5   :  { %v208_v47 = vadd.f32 %v207_v46, %v98_v45  ;;  %v105_v45 = vadd.f32 %v973_v2, %v104_v44  ;;  %v806_v44 = vld [vmem:[#allocation2 + $0x38] sm:$0xff] }
 0x4c7   :  { %843 = vtanh.f32 %v208_v47  ;;  %v211_v50 = vmul.f32 0.5, %v208_v47 }
 0x4c9   :  { %845 = vtanh.f32 %v211_v50 }
 0x4cc   :  { %v209_v48 = vpop.f32.mrf.mxu2 }
 0x4cd   :  { %v844_v49 = vpop.eup %843 }
 0x4ce   :  { %218 = vrot.lane.b32.xlu2 %v844_v49, %s936_s17 }
 0x4cf   :  { %v846_v51 = vpop.eup %845 }
 0x4d0   :  { %v213_v52 = vmul.f32 0.5, %v846_v51 }
 0x4d2   :  { %v214_v53 = vadd.f32 0.5, %v213_v52 }
 0x4d4   :  { %v216_v56 = vmul.f32 %v214_v53, %v184_v37 }
 0x528   :  { %v219_v54 = vpop.permute.xlu2 %218 }
 0x529   :  { %v221_v55 = vmul.f32 %v219_v54, %v214_v53 }
 0x52b   :  { %223 = vrot.lane.b32.xlu0 %v221_v55, %s938_s22 }
 0x59d   :  { %v224_v57 = vpop.permute.xlu0 %223 }
 0x59e   :  { %v226_v58 = vadd.f32 %v224_v57, %v216_v56 }
 0x5a0   :  { %847 = vtanh.f32 %v226_v58 }
 0x5a6   :  { %v848_v59 = vpop.eup %847 }
 0x5a7   :  { %229 = vrot.lane.b32.xlu1 %v848_v59, %s936_s17 }
 0x619   :  { %v230_v60 = vpop.permute.xlu1 %229 }
 0x61a   :  { %v232_v61 = vmul.f32 %v230_v60, %v214_v53 }
 0x61c   :  { %v233_v62 = vpack.c.bf16 %v232_v61, %v232_v61 }
 0x61e   :  { %235 = vrot.lane.b32.xlu2 %v233_v62, %s938_s22 }
 0x678   :  { %v236_v63 = vpop.permute.xlu2 %235 }
 0x679   :  { %717 = vmatmul.msk.bf16.vlgmr.msra.gmra.mxu3 %vm148_vm1, %v236_v63 }
 0x6fc   :  { %v249_v3 = vpop.f32.mrf.mxu3 }
 0x6fd   :  { %v250_v4 = vadd.f32 %v249_v3, %v100_v1 }
 0x6ff   :  { %849 = vtanh.f32 %v250_v4  ;;  %v253_v7 = vmul.f32 0.5, %v250_v4 }
 0x701   :  { %851 = vtanh.f32 %v253_v7 }
 0x704   :  { %v251_v5 = vpop.f32.mrf.mxu3 }
 0x705   :  { %v850_v6 = vpop.eup %849 }
 0x706   :  { %260 = vrot.lane.b32.xlu0 %v850_v6, %s936_s17 }
 0x707   :  { %v852_v8 = vpop.eup %851 }
 0x708   :  { %v255_v9 = vmul.f32 0.5, %v852_v8 }
 0x70a   :  { %v256_v10 = vadd.f32 0.5, %v255_v9 }
 0x70c   :  { %v258_v13 = vmul.f32 %v256_v10, %v226_v58 }
 0x778   :  { %v261_v11 = vpop.permute.xlu0 %260 }
 0x779   :  { %v263_v12 = vmul.f32 %v261_v11, %v256_v10 }
 0x77b   :  { %265 = vrot.lane.b32.xlu1 %v263_v12, %s938_s22 }
 0x7ed   :  { %v266_v14 = vpop.permute.xlu1 %265 }
 0x7ee   :  { %v268_v15 = vadd.f32 %v266_v14, %v258_v13 }
 0x7f0   :  { %853 = vtanh.f32 %v268_v15 }
 0x7f6   :  { %v854_v16 = vpop.eup %853 }
 0x7f7   :  { %271 = vrot.lane.b32.xlu2 %v854_v16, %s936_s17 }
 0x851   :  { %v272_v18 = vpop.permute.xlu2 %271 }
 0x852   :  { %v274_v19 = vmul.f32 %v272_v18, %v256_v10 }
 0x854   :  { %v275_v22 = vpack.c.bf16 %v274_v19, %v274_v19  ;;  %v110_v19 = vadd.f32 %v973_v2, %v986_v21  ;;  %v803_v21 = vld [vmem:[#allocation2 + $0x20] sm:$0xff] }
 0x855   :  { %474 = vmatpush.bf16.msra.mxu2 %v803_v21 }
 0x856   :  { %277 = vrot.lane.b32.xlu0 %v275_v22, %s938_s22 }
 0x8c8   :  { %v278_v23 = vpop.permute.xlu0 %277 }
 0x8c9   :  { %718 = vmatmul.msk.bf16.vlgmr.msra.gmra.mxu1 %vm148_vm1, %v278_v23 }
 0x946   :  { %v291_v26 = vpop.f32.mrf.mxu1 }
 0x947   :  { %v292_v27 = vadd.f32 %v291_v26, %v103_v25 }
 0x949   :  { %855 = vtanh.f32 %v292_v27  ;;  %v295_v30 = vmul.f32 0.5, %v292_v27 }
 0x94b   :  { %857 = vtanh.f32 %v295_v30 }
 0x94e   :  { %v293_v28 = vpop.f32.mrf.mxu1 }
 0x94f   :  { %v856_v29 = vpop.eup %855 }
 0x950   :  { %302 = vrot.lane.b32.xlu1 %v856_v29, %s936_s17 }
 0x951   :  { %v858_v31 = vpop.eup %857 }
 0x952   :  { %v297_v32 = vmul.f32 0.5, %v858_v31 }
 0x954   :  { %v298_v33 = vadd.f32 0.5, %v297_v32 }
 0x956   :  { %v300_v36 = vmul.f32 %v298_v33, %v268_v15 }
 0x9c2   :  { %v303_v34 = vpop.permute.xlu1 %302 }
 0x9c3   :  { %v305_v35 = vmul.f32 %v303_v34, %v298_v33 }
 0x9c5   :  { %307 = vrot.lane.b32.xlu2 %v305_v35, %s938_s22  ;;  %v802_v35 = vld [vmem:[#allocation2 + $0x18] sm:$0xff] }
 0x9c6   :  { %475 = vmatpush.bf16.msra.mxu2 %v802_v35 }
 0xa1f   :  { %v308_v37 = vpop.permute.xlu2 %307 }
 0xa20   :  { %v310_v38 = vadd.f32 %v308_v37, %v300_v36 }
 0xa22   :  { %859 = vtanh.f32 %v310_v38 }
 0xa28   :  { %v860_v39 = vpop.eup %859 }
 0xa29   :  { %313 = vrot.lane.b32.xlu0 %v860_v39, %s936_s17  ;;  %v811_v39 = vld [vmem:[#allocation2 + $0x60] sm:$0xff] }
 0xa2a   :  { %549 = vmatpush.bf16.msra.mxu3 %v811_v39 }
 0xa9b   :  { %v314_v40 = vpop.permute.xlu0 %313 }
 0xa9c   :  { %v316_v41 = vmul.f32 %v314_v40, %v298_v33  ;;  %v810_v40 = vld [vmem:[#allocation2 + $0x58] sm:$0xff] }
 0xa9d   :  { %550 = vmatpush.bf16.msra.mxu3 %v810_v40 }
 0xa9e   :  { %v317_v42 = vpack.c.bf16 %v316_v41, %v316_v41  ;;  %v809_v41 = vld [vmem:[#allocation2 + $0x50] sm:$0xff] }
 0xaa0   :  { %319 = vrot.lane.b32.xlu1 %v317_v42, %s938_s22  ;;  %v808_v42 = vld [vmem:[#allocation2 + $0x48] sm:$0xff] }
 0xaa1   :  { %551 = vmatpush.bf16.msra.mxu3 %v809_v41 }
 0xaa5   :  { %552 = vmatpush.bf16.msra.mxu3 %v808_v42 }
 0xb12   :  { %v320_v43 = vpop.permute.xlu1 %319 }
 0xb13   :  { %719 = vmatmul.msk.bf16.vlgmr.msrb.gmra.mxu2 %vm148_vm1, %v320_v43  ;;  %v807_v43 = vld [vmem:[#allocation2 + $0x40] sm:$0xff] }
 0xb14   :  { %553 = vmatpush.bf16.msra.mxu3 %v807_v43 }
 0xb18   :  { %554 = vmatpush.bf16.msra.mxu3 %v806_v44 }
 0xb96   :  { %v333_v46 = vpop.f32.mrf.mxu2 }
 0xb97   :  { %v334_v47 = vadd.f32 %v333_v46, %v105_v45  ;;  %v805_v46 = vld [vmem:[#allocation2 + $0x30] sm:$0xff] }
 0xb98   :  { %555 = vmatpush.bf16.msra.mxu3 %v805_v46 }
 0xb99   :  { %861 = vtanh.f32 %v334_v47  ;;  %v337_v50 = vmul.f32 0.5, %v334_v47  ;;  %v804_v47 = vld [vmem:[#allocation2 + $0x28] sm:$0xff] }
 0xb9b   :  { %863 = vtanh.f32 %v337_v50  ;;  %v817_v50 = vld [vmem:[#allocation2 + $0x90] sm:$0xff] }
 0xb9c   :  { %556 = vmatpush.bf16.msra.mxu3 %v804_v47 }
 0xb9e   :  { %v335_v48 = vpop.f32.mrf.mxu2 }
 0xb9f   :  { %v862_v49 = vpop.eup %861  ;;  %v819_v48 = vld [vmem:[#allocation2 + $0xa0] sm:$0xff] }
 0xba0   :  { %344 = vrot.lane.b32.xlu2 %v862_v49, %s936_s17  ;;  %630 = vmatpush.bf16.msrb.mxu0 %v819_v48  ;;  %v818_v49 = vld [vmem:[#allocation2 + $0x98] sm:$0xff] }
 0xba1   :  { %v864_v51 = vpop.eup %863 }
 0xba2   :  { %v339_v52 = vmul.f32 0.5, %v864_v51  ;;  %v816_v51 = vld [vmem:[#allocation2 + $0x88] sm:$0xff] }
 0xba4   :  { %v340_v53 = vadd.f32 0.5, %v339_v52  ;;  %631 = vmatpush.bf16.msrb.mxu0 %v818_v49  ;;  %v815_v52 = vld [vmem:[#allocation2 + $0x80] sm:$0xff] }
 0xba6   :  { %v342_v56 = vmul.f32 %v340_v53, %v310_v38 }
 0xba8   :  { %632 = vmatpush.bf16.msrb.mxu0 %v817_v50 }
 0xbac   :  { %633 = vmatpush.bf16.msrb.mxu0 %v816_v51 }
 0xbb0   :  { %634 = vmatpush.bf16.msrb.mxu0 %v815_v52 }
 0xbfa   :  { %v345_v54 = vpop.permute.xlu2 %344 }
 0xbfb   :  { %v347_v55 = vmul.f32 %v345_v54, %v340_v53  ;;  %v828_v54 = vld [vmem:[%s1054_s2 + $0x1] ss:$0 sm:$0xff] }
 0xbfd   :  { %349 = vrot.lane.b32.xlu0 %v347_v55, %s938_s22  ;;  %v813_v55 = vld [vmem:[#allocation2 + $0x70] sm:$0xff] }
 0xc6f   :  { %v350_v57 = vpop.permute.xlu0 %349 }
 0xc70   :  { %v352_v58 = vadd.f32 %v350_v57, %v342_v56 }
 0xc72   :  { %865 = vtanh.f32 %v352_v58 }
 0xc78   :  { %v866_v59 = vpop.eup %865 }
 0xc79   :  { %355 = vrot.lane.b32.xlu1 %v866_v59, %s936_s17 }
 0xceb   :  { %v356_v60 = vpop.permute.xlu1 %355 }
 0xcec   :  { %v358_v61 = vmul.f32 %v356_v60, %v340_v53  ;;  %v814_v53 = vld [vmem:[#allocation2 + $0x78] sm:$0xff] }
 0xced   :  { %635 = vmatpush.bf16.msrb.mxu0 %v814_v53 }
 0xcee   :  { %v359_v62 = vpack.c.bf16 %v358_v61, %v358_v61  ;;  %v812_v61 = vld [vmem:[#allocation2 + $0x68] sm:$0xff] }
 0xcf0   :  { %361 = vrot.lane.b32.xlu2 %v359_v62, %s938_s22  ;;  %v829_v62 = vld [vmem:[%s1054_s2 + $0x2] ss:$0 sm:$0xff] }
 0xcf1   :  { %636 = vmatpush.bf16.msrb.mxu0 %v813_v55 }
 0xcf5   :  { %637 = vmatpush.bf16.msrb.mxu0 %v812_v61 }
 0xd4a   :  { %v362_v63 = vpop.permute.xlu2 %361 }
 0xd4b   :  { %720 = vmatmul.msk.bf16.vlgmr.msrb.gmra.mxu3 %vm148_vm1, %v362_v63 }
 0xdce   :  { %v375_v1 = vpop.f32.mrf.mxu3 }
 0xdcf   :  { %v376_v3 = vadd.f32 %v375_v1, %v108_v0 }
 0xdd1   :  { %867 = vtanh.f32 %v376_v3  ;;  %v379_v6 = vmul.f32 0.5, %v376_v3 }
 0xdd3   :  { %869 = vtanh.f32 %v379_v6 }
 0xdd6   :  { %v377_v4 = vpop.f32.mrf.mxu3 }
 0xdd7   :  { %v868_v5 = vpop.eup %867 }
 0xdd8   :  { %386 = vrot.lane.b32.xlu0 %v868_v5, %s936_s17  ;;  %v830_v5 = vld [vmem:[%s1054_s2 + $0x3] ss:$0 sm:$0xff]  ;;  %s940_s2 = smov [#allocation5]  }
 0xdd9   :  { %v870_v7 = vpop.eup %869  ;;  %s671_s8 = sshll.u32 %s940_s2, 4  ;;  %s672_s8 = int_to_ptr.vmem [resolvable:$true] %s671_s8 }
 0xdda   :  { %v381_v8 = vmul.f32 0.5, %v870_v7 }
 0xddc   :  { %v382_v9 = vadd.f32 0.5, %v381_v8 }
 0xdde   :  { %v384_v12 = vmul.f32 %v382_v9, %v352_v58 }
 0xe4a   :  { %v387_v10 = vpop.permute.xlu0 %386 }
 0xe4b   :  { %v389_v11 = vmul.f32 %v387_v10, %v382_v9 }
 0xe4d   :  { %391 = vrot.lane.b32.xlu1 %v389_v11, %s938_s22 }
 0xebf   :  { %v392_v13 = vpop.permute.xlu1 %391 }
 0xec0   :  { %v394_v14 = vadd.f32 %v392_v13, %v384_v12 }
 0xec2   :  { %871 = vtanh.f32 %v394_v14 }
 0xec8   :  { %v872_v20 = vpop.eup %871 }
 0xec9   :  { %397 = vrot.lane.b32.xlu2 %v872_v20, %s936_s17 }
 0xf23   :  { %v398_v15 = vpop.permute.xlu2 %397 }
 0xf24   :  { %v400_v16 = vmul.f32 %v398_v15, %v382_v9 }
 0xf26   :  { %v401_v17 = vpack.c.bf16 %v400_v16, %v400_v16 }
 0xf28   :  { %403 = vrot.lane.b32.xlu0 %v401_v17, %s938_s22 }
 0xf9a   :  { %v404_v18 = vpop.permute.xlu0 %403 }
 0xf9b   :  { %721 = vmatmul.msk.bf16.vlgmr.msrb.gmra.mxu1 %vm148_vm1, %v404_v18 }
0x1018   :  { %v417_v22 = vpop.f32.mrf.mxu1 }
0x1019   :  { %v418_v23 = vadd.f32 %v417_v22, %v110_v19 }
0x101b   :  { %873 = vtanh.f32 %v418_v23  ;;  %v421_v26 = vmul.f32 0.5, %v418_v23 }
0x101d   :  { %875 = vtanh.f32 %v421_v26 }
0x1020   :  { %v419_v24 = vpop.f32.mrf.mxu1 }
0x1021   :  { %v874_v25 = vpop.eup %873 }
0x1022   :  { %428 = vrot.lane.b32.xlu1 %v874_v25, %s936_s17 }
0x1023   :  { %v876_v27 = vpop.eup %875 }
0x1024   :  { %v423_v28 = vmul.f32 0.5, %v876_v27 }
0x1026   :  { %v424_v29 = vadd.f32 0.5, %v423_v28 }
0x1028   :  { %v426_v32 = vmul.f32 %v424_v29, %v394_v14 }
0x1094   :  { %v429_v30 = vpop.permute.xlu1 %428 }
0x1095   :  { %v431_v31 = vmul.f32 %v429_v30, %v424_v29 }
0x1097   :  { %433 = vrot.lane.b32.xlu2 %v431_v31, %s938_s22 }
0x10f1   :  { %v434_v33 = vpop.permute.xlu2 %433 }
0x10f2   :  { %v436_v34 = vadd.f32 %v434_v33, %v426_v32 }
0x10f4   :  { %877 = vtanh.f32 %v436_v34 }
0x10fa   :  { %v878_v2 = vpop.eup %877 }
0x10fb   :  { %439 = vrot.lane.b32.xlu0 %v878_v2, %s936_s17 }
0x116d   :  { %v440_v36 = vpop.permute.xlu0 %439 }
0x116e   :  { %v442_v37 = vmul.f32 %v440_v36, %v424_v29 }
0x1170   :  { %v443_v38 = vpack.c.bf16 %v442_v37, %v442_v37 }
0x1172   :  { %451 = vrot.lane.b32.xlu1 %v443_v38, %s938_s22 }
0x11e4   :  { %v452_v45 = vpop.permute.xlu1 %451 }
0x11e5   :  { %730 = vmatmul.msk.bf16.vlgmr.msra.gmra.mxu2 %vm148_vm1, %v452_v45 }
0x1268   :  { %v477_v56 = vpop.f32.mrf.mxu2 }
0x1269   :  { %v478_v57 = vadd.f32 %v828_v54, %v477_v56 }
0x126b   :  { %v481_v58 = vmax.f32 %v478_v57, 0.0 }
0x126d   :  { %v482_v59 = vpack.c.bf16 %v481_v58, %v481_v58 }
0x126f   :  { %557 = vmatmul.bf16.vlgmr.msra.gmra.mxu3 %v482_v59 }
0x1270   :  { %v479_v60 = vpop.f32.mrf.mxu2 }
0x12f2   :  { %v558_v63 = vpop.f32.mrf.mxu3 }
0x12f3   :  { %v559_v0 = vadd.f32 %v829_v62, %v558_v63 }
0x12f5   :  { %v562_v1 = vmax.f32 %v559_v0, 0.0 }
0x12f7   :  { %v563_v3 = vpack.c.bf16 %v562_v1, %v562_v1 }
0x12f9   :  { %638 = vmatmul.bf16.vlgmr.msrb.gmra.mxu0 %v563_v3 }
0x12fa   :  { %v560_v4 = vpop.f32.mrf.mxu3 }
0x1376   :  { %v639_v6 = vpop.f32.mrf.mxu0 }
0x1377   :  { %v640_v7 = vadd.f32 %v830_v5, %v639_v6 }
0x1379   :  { %643 = vmax.xlane.f32.xlu2 %v640_v7 }
0x137e   :  { %v641_v8 = vpop.f32.mrf.mxu0 }
0x13ec   :  { %v644_v9 = vpop.xlane.xlu2 %643 }
0x13ed   :  { %v645_v10 = vsub.f32 %v640_v7, %v644_v9 }
0x13ef   :  { %v646_v11 = vmul.f32 1.442695, %v645_v10 }
0x13f1   :  { %879 = vpow2.f32 %v646_v11 }
0x13f7   :  { %v880_v12 = vpop.eup %879 }
0x13f8   :  { %648 = vadd.xlane.f32.xlu0 %v880_v12 }
0x146b   :  { %v649_v13 = vpop.xlane.xlu0 %648 }
0x146c   :  { %881 = vrcp.f32 %v649_v13  ;;  %v661_v16 = vand.u32 2147483648, %v649_v13  ;;  %v659_v18 = vand.u32 2147483647, %v649_v13  ;;  %vm655_vm3 = vweird.f32 %v649_v13 }
0x146e   :  { %v662_v22 = vor.u32 1.1754944e-38, %v661_v16  ;;  %vm660_vm5 = vcmp.eq.f32.partialorder %v659_v18, 8.507059e+37 }
0x1472   :  { %v882_v14 = vpop.eup %881 }
0x1473   :  { %v651_v20 = vmul.f32 %v882_v14, %v649_v13  ;;  %vm656_vm2 = vweird.f32 %v882_v14 }
0x1474   :  { %vm657_vm4 = vmor %vm655_vm3, %vm656_vm2 }
0x1475   :  { %v652_v15 = vsub.f32 1.0, %v651_v20 }
0x1477   :  { %v653_v17 = vmul.f32 %v882_v14, %v652_v15 }
0x1479   :  { %v654_v19 = vadd.f32 %v882_v14, %v653_v17 }
0x147b   :  { %v658_v23 = vsel %vm657_vm4, %v882_v14, %v654_v19 }
0x147c   :  { %v663_v24 = vsel %vm660_vm5, %v662_v22, %v658_v23 }
0x147d   :  { %v664_v25 = vmul.f32 %v880_v12, %v663_v24 }
0x147f   :  { %665 = vst [vmem:[#allocation5] sm:$0xff] %v664_v25 }
0x1480   :  { %676 = dma.vmem_to_hbm [thread:$0]  %s672_s8, 128, %s674_s11, [#allocation4]  }
0x1481   :  { %933 = dma.done.wait [#allocation4], 128  }
0x1482   :  { %934 = vsyncadd [#allocation4], 4294967168 }
0x1483   :  { %681 = vsyncpa [#allocation3], 1 }
0x1484   :  { %682 = vsyncpa [#allocation4], 1 }

</bundles_post_ra>
